<compile_context>
chip_gen: v7x
topology: tpu7x:2x2x1
jax: 0.10.0
libtpu: 0.0.40
codegen_flags: <defaults>
</compile_context>

<pallas_src>
import jax
import jax.numpy as jnp
from jax.experimental import pallas as pl
from jax.experimental.pallas import tpu as pltpu

HIDDEN_SIZE = 50
N = 5
INPUT_SIZE = N * 4            # 20
NUM_LAYERS = 5                # 5 Linear layers total (4 ReLUs)

IN_PAD = 32                   # 20 -> 32  (sublane-friendly for f32/bf16)
OUT_PAD = 32                  # 20 -> 32
HID_PAD = 64                  # 50 -> 64  (hidden width, VMEM-resident only)


def _round_up(x, m):
    return ((x + m - 1) // m) * m


def _choose_tb(Bp, block_b):
    """Batch (lane) tile: multiple of 128 dividing Bp, <= block_b; prefer >=2 steps."""
    assert Bp % 128 == 0, "packed batch must be a multiple of 128"
    tb = max(128, (min(block_b, Bp) // 128) * 128)
    while Bp % tb:
        tb -= 128
    # v7x has 2 TensorCores: a single grid step cannot shard the "parallel"
    # axis across them, so split in two when the batch allows (free 2x on v7x).
    if Bp // tb < 2:
        half = (Bp // 2) // 128 * 128
        if half >= 128 and Bp % half == 0:
            tb = half
    return tb


def _mlp_kernel(x_ref, w_ref, b_ref, o_ref):
    """One (*, TB) batch tile through all 5 layers; weights/biases VMEM-resident.

    Layout: batch on the lane axis.  x_ref: (IN_PAD, TB) compute-dtype,
    w_ref: (5, HID_PAD, HID_PAD) compute-dtype (PyTorch (out, in) orientation),
    b_ref: (5, HID_PAD, 1) f32, o_ref: (OUT_PAD, TB) f32.
    """
    cdt = w_ref.dtype
    h = x_ref[...]                                            # (IN_PAD, TB)

    # Layer 0: (HID_PAD, IN_PAD) @ (IN_PAD, TB) -> (HID_PAD, TB), f32 accumulate.
    acc = jnp.dot(w_ref[0, :, :IN_PAD], h,
                  preferred_element_type=jnp.float32) + b_ref[0]
    h = jnp.maximum(acc, 0.0).astype(cdt)

    # Hidden layers 1..3: (HID_PAD, HID_PAD) @ (HID_PAD, TB). Short static unroll.
    for layer in range(1, NUM_LAYERS - 1):
        acc = jnp.dot(w_ref[layer], h,
                      preferred_element_type=jnp.float32) + b_ref[layer]
        h = jnp.maximum(acc, 0.0).astype(cdt)

    # Layer 4 (no ReLU): (OUT_PAD, HID_PAD) @ (HID_PAD, TB) -> (OUT_PAD, TB).
    acc = jnp.dot(w_ref[NUM_LAYERS - 1, :OUT_PAD, :], h,
                  preferred_element_type=jnp.float32) + b_ref[NUM_LAYERS - 1, :OUT_PAD]
    o_ref[...] = acc.astype(o_ref.dtype)


def deepnet_forward_packed(xp, w_stack, b_stack, *, block_b=1024):
    """Zero-copy path: xp is the persistent packed layout (IN_PAD, Bp).

    Returns the packed output (OUT_PAD, Bp) f32 (rows >= 20 are zeros; batch
    columns >= the real batch hold padded-row garbage and should be ignored).
    """
    f_pad, Bp = xp.shape
    assert f_pad == IN_PAD
    TB = _choose_tb(Bp, block_b)

    return pl.pallas_call(
        _mlp_kernel,
        out_shape=jax.ShapeDtypeStruct((OUT_PAD, Bp), jnp.float32),
        grid=(Bp // TB,),
        in_specs=[
            # Activation tile: lane-dense (TB multiple of 128), narrow feature axis.
            pl.BlockSpec((IN_PAD, TB), lambda i: (0, i)),
            # Resident parameter stacks: constant index_map -> DMA'd once.
            pl.BlockSpec((NUM_LAYERS, HID_PAD, HID_PAD), lambda i: (0, 0, 0)),
            pl.BlockSpec((NUM_LAYERS, HID_PAD, 1), lambda i: (0, 0, 0)),
        ],
        out_specs=pl.BlockSpec((OUT_PAD, TB), lambda i: (0, i)),
        compiler_params=pltpu.CompilerParams(
            dimension_semantics=("parallel",),        # megacore-shard batch tiles (v7x)
            vmem_limit_bytes=32 * 1024 * 1024,        # within v7x 64 MiB physical VMEM
        ),
    )(xp, w_stack, b_stack)


def pack_activations(x, dtype=jnp.float32):
    """(B, 20) -> packed (IN_PAD, Bp) with batch on the lane axis, zero-padded."""
    B, F = x.shape
    assert F == INPUT_SIZE
    Bp = _round_up(B, 128)
    xp = jnp.zeros((IN_PAD, Bp), dtype)
    return xp.at[:F, :B].set(x.T.astype(dtype))


def unpack_activations(out_packed, batch):
    """Packed (OUT_PAD, Bp) -> (batch, 20)."""
    return out_packed[:INPUT_SIZE, :batch].T


def deepnet_forward(x, w_stack, b_stack, *, block_b=1024):
    """Convenience wrapper for (B, 20) inputs.

    The pack/unpack copies now touch only the 32-wide (1.6x) arrays instead of
    the old 128-wide (6.4x) ones; for repeated calls keep activations packed
    and use `deepnet_forward_packed` directly.
    """
    B = x.shape[0]
    xp = pack_activations(x, dtype=w_stack.dtype)
    outp = deepnet_forward_packed(xp, w_stack, b_stack, block_b=block_b)
    return unpack_activations(outp, B)


def init_params(key):
    """PyTorch nn.Linear-style init: W (out, in), b (out,), U[-1/sqrt(fan_in), +...]."""
    dims = [INPUT_SIZE] + [HIDDEN_SIZE] * (NUM_LAYERS - 1) + [INPUT_SIZE]
    params = []
    for i in range(NUM_LAYERS):
        fan_in, fan_out = dims[i], dims[i + 1]
        key, kw, kb = jax.random.split(key, 3)
        bound = 1.0 / jnp.sqrt(jnp.float32(fan_in))
        w = jax.random.uniform(kw, (fan_out, fan_in), jnp.float32, -bound, bound)
        b = jax.random.uniform(kb, (fan_out,), jnp.float32, -bound, bound)
        params.append((w, b))
    return params


def pack_params(params, dtype=jnp.float32):
    """Zero-pad each layer to (HID_PAD, HID_PAD)/(HID_PAD, 1) and stack.

    Weights are cast to `dtype` (f32 exact path, or bf16 for the v5e-friendly
    MXU single-pass path); biases stay f32 (added after the f32 accumulate).
    """
    w_stack = jnp.zeros((NUM_LAYERS, HID_PAD, HID_PAD), dtype)
    b_stack = jnp.zeros((NUM_LAYERS, HID_PAD, 1), jnp.float32)
    for i, (w, b) in enumerate(params):
        out_f, in_f = w.shape
        w_stack = w_stack.at[i, :out_f, :in_f].set(w.astype(dtype))
        b_stack = b_stack.at[i, :out_f, 0].set(b)
    return w_stack, b_stack


def deepnet_reference(x, params):
    """Pure-JAX reference mirroring the PyTorch module (unpadded, f32)."""
    h = x
    for i, (w, b) in enumerate(params):
        h = h @ w.T + b
        if i < len(params) - 1:
            h = jnp.maximum(h, 0.0)
    return h


if __name__ == "__main__":
    key = jax.random.PRNGKey(0)
    key, kx = jax.random.split(key)

    B = 256
    x = jax.random.normal(kx, (B, INPUT_SIZE), jnp.float32)
    params = init_params(key)
    ref = deepnet_reference(x, params)

    # --- f32 path (exact contract), zero-copy packed layout, 2 grid steps. ---
    w32, b32 = pack_params(params, jnp.float32)
    xp32 = pack_activations(x, jnp.float32)
    outp = deepnet_forward_packed(xp32, w32, b32, block_b=1024)
    outp = jax.block_until_ready(outp)
    out = unpack_activations(outp, B)
    assert out.shape == (B, INPUT_SIZE)
    assert jnp.allclose(out, ref, atol=1e-5, rtol=1e-5), "f32 mismatch vs reference"

    # --- bf16 path (v5e: avoids f32 multi-pass MXU; smaller DMA everywhere). ---
    w16, b16 = pack_params(params, jnp.bfloat16)
    out16 = deepnet_forward(x, w16, b16, block_b=1024)
    out16 = jax.block_until_ready(out16)
    assert float(jnp.max(jnp.abs(out16 - ref))) < 1e-1, "bf16 path out of tolerance"

    print("KERNEL_OK")
</pallas_src>

<mosaic_0001>
module attributes {stable_mosaic.version = 11 : i64} {
  func.func @_mlp_kernel(%arg0: i32, %arg1: memref<32x128xf32, #tpu.memory_space<vmem>>, %arg2: memref<5x64x64xf32, #tpu.memory_space<vmem>>, %arg3: memref<5x64x1xf32, #tpu.memory_space<vmem>>, %arg4: memref<32x128xf32, #tpu.memory_space<vmem>>) attributes {dimension_semantics = [#tpu.dimension_semantics<parallel>], iteration_bounds = array<i64: 2>, scalar_prefetch = 0 : i64, scratch_operands = 0 : i64, tpu.core_type = #tpu.core_type<tc>, window_params = [{transform_indices = @transform_0, window_bounds = array<i64: 32, 128>}, {pipeline_mode = #tpu.pipeline_mode<synchronous>, transform_indices = @transform_1, window_bounds = array<i64: 5, 64, 64>}, {pipeline_mode = #tpu.pipeline_mode<synchronous>, transform_indices = @transform_2, window_bounds = array<i64: 5, 64, 1>}, {transform_indices = @transform_3, window_bounds = array<i64: 32, 128>}]} {
    %c0 = arith.constant 0 : index
    %c0_0 = arith.constant 0 : index
    %0 = vector.load %arg1[%c0, %c0_0] : memref<32x128xf32, #tpu.memory_space<vmem>>, vector<32x128xf32>
    %c0_1 = arith.constant 0 : index
    %c0_2 = arith.constant 0 : index
    %c0_3 = arith.constant 0 : index
    %1 = vector.load %arg2[%c0_1, %c0_2, %c0_3] : memref<5x64x64xf32, #tpu.memory_space<vmem>>, vector<1x64x32xf32>
    %2 = vector.shape_cast %1 : vector<1x64x32xf32> to vector<64x32xf32>
    %cst = arith.constant dense<0.000000e+00> : vector<64x128xf32>
    %3 = tpu.matmul %2, %0, %cst {dimension_numbers = #tpu.dot_dimension_numbers<[1], [0], [0], [1], [0, 0, 1, 1], [], []>} : vector<64x32xf32>, vector<32x128xf32>, vector<64x128xf32> -> vector<64x128xf32>
    %c0_4 = arith.constant 0 : index
    %c0_5 = arith.constant 0 : index
    %c0_6 = arith.constant 0 : index
    %4 = vector.load %arg3[%c0_4, %c0_5, %c0_6] : memref<5x64x1xf32, #tpu.memory_space<vmem>>, vector<1x64x1xf32>
    %5 = vector.shape_cast %4 : vector<1x64x1xf32> to vector<64x1xf32>
    %6 = vector.broadcast %5 : vector<64x1xf32> to vector<64x128xf32>
    %7 = arith.addf %3, %6 : vector<64x128xf32>
    %cst_7 = arith.constant 0.000000e+00 : f32
    %8 = vector.broadcast %cst_7 : f32 to vector<64x128xf32>
    %9 = arith.maximumf %7, %8 : vector<64x128xf32>
    %c1 = arith.constant 1 : index
    %c0_8 = arith.constant 0 : index
    %c0_9 = arith.constant 0 : index
    %10 = vector.load %arg2[%c1, %c0_8, %c0_9] : memref<5x64x64xf32, #tpu.memory_space<vmem>>, vector<1x64x64xf32>
    %11 = vector.shape_cast %10 : vector<1x64x64xf32> to vector<64x64xf32>
    %cst_10 = arith.constant dense<0.000000e+00> : vector<64x128xf32>
    %12 = tpu.matmul %11, %9, %cst_10 {dimension_numbers = #tpu.dot_dimension_numbers<[1], [0], [0], [1], [0, 0, 1, 1], [], []>} : vector<64x64xf32>, vector<64x128xf32>, vector<64x128xf32> -> vector<64x128xf32>
    %c1_11 = arith.constant 1 : index
    %c0_12 = arith.constant 0 : index
    %c0_13 = arith.constant 0 : index
    %13 = vector.load %arg3[%c1_11, %c0_12, %c0_13] : memref<5x64x1xf32, #tpu.memory_space<vmem>>, vector<1x64x1xf32>
    %14 = vector.shape_cast %13 : vector<1x64x1xf32> to vector<64x1xf32>
    %15 = vector.broadcast %14 : vector<64x1xf32> to vector<64x128xf32>
    %16 = arith.addf %12, %15 : vector<64x128xf32>
    %cst_14 = arith.constant 0.000000e+00 : f32
    %17 = vector.broadcast %cst_14 : f32 to vector<64x128xf32>
    %18 = arith.maximumf %16, %17 : vector<64x128xf32>
    %c2 = arith.constant 2 : index
    %c0_15 = arith.constant 0 : index
    %c0_16 = arith.constant 0 : index
    %19 = vector.load %arg2[%c2, %c0_15, %c0_16] : memref<5x64x64xf32, #tpu.memory_space<vmem>>, vector<1x64x64xf32>
    %20 = vector.shape_cast %19 : vector<1x64x64xf32> to vector<64x64xf32>
    %cst_17 = arith.constant dense<0.000000e+00> : vector<64x128xf32>
    %21 = tpu.matmul %20, %18, %cst_17 {dimension_numbers = #tpu.dot_dimension_numbers<[1], [0], [0], [1], [0, 0, 1, 1], [], []>} : vector<64x64xf32>, vector<64x128xf32>, vector<64x128xf32> -> vector<64x128xf32>
    %c2_18 = arith.constant 2 : index
    %c0_19 = arith.constant 0 : index
    %c0_20 = arith.constant 0 : index
    %22 = vector.load %arg3[%c2_18, %c0_19, %c0_20] : memref<5x64x1xf32, #tpu.memory_space<vmem>>, vector<1x64x1xf32>
    %23 = vector.shape_cast %22 : vector<1x64x1xf32> to vector<64x1xf32>
    %24 = vector.broadcast %23 : vector<64x1xf32> to vector<64x128xf32>
    %25 = arith.addf %21, %24 : vector<64x128xf32>
    %cst_21 = arith.constant 0.000000e+00 : f32
    %26 = vector.broadcast %cst_21 : f32 to vector<64x128xf32>
    %27 = arith.maximumf %25, %26 : vector<64x128xf32>
    %c3 = arith.constant 3 : index
    %c0_22 = arith.constant 0 : index
    %c0_23 = arith.constant 0 : index
    %28 = vector.load %arg2[%c3, %c0_22, %c0_23] : memref<5x64x64xf32, #tpu.memory_space<vmem>>, vector<1x64x64xf32>
    %29 = vector.shape_cast %28 : vector<1x64x64xf32> to vector<64x64xf32>
    %cst_24 = arith.constant dense<0.000000e+00> : vector<64x128xf32>
    %30 = tpu.matmul %29, %27, %cst_24 {dimension_numbers = #tpu.dot_dimension_numbers<[1], [0], [0], [1], [0, 0, 1, 1], [], []>} : vector<64x64xf32>, vector<64x128xf32>, vector<64x128xf32> -> vector<64x128xf32>
    %c3_25 = arith.constant 3 : index
    %c0_26 = arith.constant 0 : index
    %c0_27 = arith.constant 0 : index
    %31 = vector.load %arg3[%c3_25, %c0_26, %c0_27] : memref<5x64x1xf32, #tpu.memory_space<vmem>>, vector<1x64x1xf32>
    %32 = vector.shape_cast %31 : vector<1x64x1xf32> to vector<64x1xf32>
    %33 = vector.broadcast %32 : vector<64x1xf32> to vector<64x128xf32>
    %34 = arith.addf %30, %33 : vector<64x128xf32>
    %cst_28 = arith.constant 0.000000e+00 : f32
    %35 = vector.broadcast %cst_28 : f32 to vector<64x128xf32>
    %36 = arith.maximumf %34, %35 : vector<64x128xf32>
    %c4 = arith.constant 4 : index
    %c0_29 = arith.constant 0 : index
    %c0_30 = arith.constant 0 : index
    %37 = vector.load %arg2[%c4, %c0_29, %c0_30] : memref<5x64x64xf32, #tpu.memory_space<vmem>>, vector<1x32x64xf32>
    %38 = vector.shape_cast %37 : vector<1x32x64xf32> to vector<32x64xf32>
    %cst_31 = arith.constant dense<0.000000e+00> : vector<32x128xf32>
    %39 = tpu.matmul %38, %36, %cst_31 {dimension_numbers = #tpu.dot_dimension_numbers<[1], [0], [0], [1], [0, 0, 1, 1], [], []>} : vector<32x64xf32>, vector<64x128xf32>, vector<32x128xf32> -> vector<32x128xf32>
    %c4_32 = arith.constant 4 : index
    %c0_33 = arith.constant 0 : index
    %c0_34 = arith.constant 0 : index
    %40 = vector.load %arg3[%c4_32, %c0_33, %c0_34] : memref<5x64x1xf32, #tpu.memory_space<vmem>>, vector<1x32x1xf32>
    %41 = vector.shape_cast %40 : vector<1x32x1xf32> to vector<32x1xf32>
    %42 = vector.broadcast %41 : vector<32x1xf32> to vector<32x128xf32>
    %43 = arith.addf %39, %42 : vector<32x128xf32>
    %c0_35 = arith.constant 0 : index
    %c0_36 = arith.constant 0 : index
    %44 = vector.load %arg4[%c0_35, %c0_36] : memref<32x128xf32, #tpu.memory_space<vmem>>, vector<32x128xf32>
    tpu.vector_store %arg4[%c0_35, %c0_36], %43 {strides = array<i32>} : memref<32x128xf32, #tpu.memory_space<vmem>>, vector<32x128xf32>,
    return
  }
  func.func @transform_0(%arg0: i32) -> (i32, i32) {
    %c0_i32 = arith.constant 0 : i32
    %c0_i32_0 = arith.constant 0 : i32
    return %c0_i32, %arg0 : i32, i32
  }
  func.func @transform_1(%arg0: i32) -> (i32, i32, i32) {
    %c0_i32 = arith.constant 0 : i32
    %c0_i32_0 = arith.constant 0 : i32
    %c0_i32_1 = arith.constant 0 : i32
    %c0_i32_2 = arith.constant 0 : i32
    return %c0_i32, %c0_i32_0, %c0_i32_1 : i32, i32, i32
  }
  func.func @transform_2(%arg0: i32) -> (i32, i32, i32) {
    %c0_i32 = arith.constant 0 : i32
    %c0_i32_0 = arith.constant 0 : i32
    %c0_i32_1 = arith.constant 0 : i32
    %c0_i32_2 = arith.constant 0 : i32
    return %c0_i32, %c0_i32_0, %c0_i32_1 : i32, i32, i32
  }
  func.func @transform_3(%arg0: i32) -> (i32, i32) {
    %c0_i32 = arith.constant 0 : i32
    %c0_i32_0 = arith.constant 0 : i32
    return %c0_i32, %arg0 : i32, i32
  }
}

</mosaic_0001>

<bundles_post_ra>
// kernel: tpu_custom_call.1
= control target key start
LH: loop header
LB: loop body
LE: loop exit
PB: predicated region body
PF: predicated region fallthrough
CT: control target
= control target key end

     0   :  { %8 = vsyncpa [#allocation3], 0  ;;  %s2165_s0 = inlined_call_operand.hbm [shape: f32[32,256], index: 0, kind: input, shape index: {}]   ;;  %s2166_s1 = inlined_call_operand.vmem [shape: f32[5,64,64], index: 1, kind: input, shape index: {}]   ;;  %s2167_s2 = inlined_call_operand.vmem [shape: f32[5,64,1], index: 2, kind: input, shape index: {}]   ;;  %s2168_s3 = inlined_call_operand.hbm [shape: f32[32,256], index: 3, kind: output, shape index: {}]  }
   0x1   :  { %10 = vsyncpa [#allocation3 + $0x1], 0 }
   0x2   :  { %11 = vsyncpa [#allocation4], 0 }
   0x3   :  { %13 = vsyncpa [#allocation4 + $0x1], 0  ;;  %s1745_s12 = smov 0   ;;  %s1747_s13 = smov 0  }
   0x4   :  { %s1749_s14 = smov 0   ;;  %s1751_s15 = smov 0  }
   0x5 LB: > { %s1766_s16 = sadd.s32 4294967295, %s1714_s15   ;;  %s1189_s17 = sadd.s32 4294967294, %s1714_s15   ;;  %s1714_s15 = sphi %s1751_s15, %s2182_s15   ;;  %s1710_s14 = sphi %s1749_s14, %s2181_s14   ;;  %s1706_s13 = sphi %s1747_s13, %s2180_s13   ;;  %s1702_s12 = sphi %s1745_s12, %s2179_s12  }
   0x6   : > { %s1770_s18 = sadd.s32 1, %s1714_s15   ;;  %s26_s19 = sadd.s32 1, %s1710_s14 }
   0x7   : > { %s23_s20 = ssub.s32 %s1714_s15, %s1770_s18  ;;  %p33_p0 = scmp.ne.s32.totalorder %s1710_s14, %s1706_s13 }
   0x8   : > { %p24_p1 = scmp.eq.s32.totalorder %s23_s20, 0  ;;  %p34_p2 = scmp.eq.s32.totalorder %s1714_s15, 0 }
   0x9   : > { %p39_p3 = scmp.ne.s32.totalorder %s1706_s13, %s1702_s12  ;;  %p40_p4 = scmp.eq.s32.totalorder %s1766_s16, 0 }
   0xa   : > { %s1782_s21 = scalar_select %p24_p1, %s1710_s14, %s26_s19  }
   0xb   : > { %p1784_p5 = por %p34_p2, %p33_p0  ;;  %p1788_p6 = por %p40_p4, %p39_p3 }
   0xc   : > { %p105_p7 = scmp.eq.s32.totalorder %s1766_s16, 1  ;;  %p111_p8 = scmp.eq.s32.totalorder %s1189_s17, 1 }
   0xd   : > { %p1575_p10 = scmp.lt.s32.totalorder %s1714_s15, 2  ;;  %s137_s26 = sand.u32 1, %s1710_s14  }
   0xe   : > { %p1795_p11 = por %p105_p7, %p33_p0  ;;  %p1799_p12 = por %p111_p8, %p39_p3 }
   0xf   : > { %s1193_s27 = sshll.u32 %s1714_s15, 7  ;;  %s1192_s28 = sshll.u32 %s137_s26, 5 }
  0x10   : > { %s2172_s24 = scalar_select %p1795_p11, 1, 0 }
  0x11   : > { %s2173_s25 = scalar_select %p1799_p12, 1, 0 }
  0x12   : > { %s1808_s4 = scalar_lea.hbm %s2165_s0, %s1193_s27  ;;  %s141_s5 = scalar_lea.vmem [#allocation2], %s1192_s28 }
  0x13   : > { %s147_s6 = sshll.u32 %s141_s5, 4  ;;  %p1812_p13 = pnand %p1575_p10, %p1784_p5  ;;  %s1816_s6 = int_to_ptr.vmem [resolvable:$true] %s147_s6 }
  0x14   : > { %s1819_s8 = scalar_lea.sflag [#allocation3], %s137_s26  ;;  %s1618_s9 = scalar_lea.hbm %s1808_s4, 512 }
  0x15   : > { %p1619_p1 = scmp.ne.s32.totalorder %s1808_s4, %s1618_s9  ;;  %p1620_p2 = pneg %p1812_p13 }
  0x16   : > { %s1623_s17 = scalar_lea.hbm %s2165_s0, 1024  ;;  %p1624_p5 = scmp.lt.u32.totalorder %s1808_s4, %s2165_s0 }
  0x17   : > { %p1621_p3 = pnand %p1620_p2, %p1619_p1  ;;  %p1625_p7 = scmp.lt.u32.totalorder %s1623_s17, %s1618_s9 }
  0x18   : > { %p1627_p10 = scmp.lt.u32.totalorder %s1618_s9, %s1808_s4 }
  0x19   : > { %p1622_p4 = pneg %p1621_p3  ;;  %p1626_p8 = por %p1625_p7, %p1624_p5 }
  0x1b   : > { %p1628_p9 = por %p1627_p10, %p1626_p8 }
  0x1d   : > { %p1629_p0 = pnand %p1628_p9, %p1622_p4 }
  0x1f   : > { %1632 = shalt.err (!%p1629_p0)
}
  0x20   : > { %s1633_s22 = scalar_lea.vmem %s1816_s6, 512  ;;  %s1716_s26 = smov [#allocation2]  }
  0x21   : > { %p1634_p1 = scmp.ne.s32.totalorder %s1816_s6, %s1633_s22  ;;  %s1638_s27 = sshll.u32 %s1716_s26, 4  ;;  %s1639_s27 = int_to_ptr.vmem [resolvable:$false] %s1638_s27 }
  0x22   : > { %s1640_s28 = scalar_lea.vmem %s1639_s27, 1024  ;;  %p1641_p11 = scmp.lt.s32.totalorder %s1816_s6, %s1639_s27 }
  0x23   : > { %p1636_p3 = pnand %p1634_p1, %p1620_p2  ;;  %p1642_p5 = scmp.lt.s32.totalorder %s1640_s28, %s1633_s22 }
  0x25   : > { %p1637_p12 = pneg %p1636_p3  ;;  %p1643_p7 = por %p1642_p5, %p1641_p11 }
  0x27   : > { %p1644_p8 = pnand %p1643_p7, %p1637_p12 }
  0x29   : > { %1647 = shalt.err (!%p1644_p8)
}
  0x2a   : > { %s1717_s29 = smov 256   ;;  %s1718_s30 = smov 128  }
  0x2b   : > { %s1719_s5 = smov 8   ;;  %p155_p9 = scmp.lt.s32.totalorder %s1714_s15, 3 }
  0x2c   : > { %1570 = dma.hbm_to_vmem [thread:$0]  (!%p1812_p13), %s1808_s4, 512, %s1816_s6, %s1819_s8, %s1717_s29, %s1718_s30, %s1719_s5  }
  0x2d   : > { %p2175_p0 = scmp.ge.s32.totalorder %s1714_s15, 1 }
  0x2f   : > { %p156_p2 = pnand %p2175_p0, %p155_p9 }
  0x30   : > { %s1851_s9 = sand.u32 (!%p156_p2), 1, %s1706_s13  }
  0x31   : > { %159 = sbr.rel (%p156_p2) target bundleno = 1243 (0x4db), region = 32  ;;  %s1195_s10 = sshll.u32 (!%p156_p2), %s1851_s9, 5 }
  0x32   : > { %s162_s11 = scalar_lea.sflag (!%p156_p2), [#allocation3], %s1851_s9  ;;  %s165_s17 = scalar_lea.vmem (!%p156_p2), [#allocation2], %s1195_s10 }
  0x38   : > { %1693 = dma.done.wait (%p1788_p6), %s162_s11, 512  }
  0x39   : > { %1695 = vsyncadd (%p1788_p6), %s162_s11, 4294966784  ;;  %v1720_v0 = vmov 0   ;;  %vm248_vm0 = vcmask 261120   ;;  %v188_v1 = vld [vmem:[%s165_s17] sm:$0xff]  ;;  %v189_v2 = vld [vmem:[%s165_s17 + $0x8] sm:$0xff]  ;;  %vm444_vm1 = vcmask 523264  }
  0x3a   : > { %1616 = vset.pattern.permute.xlu0 %v1720_v0  ;;  %1617 = vset.pattern.permute.xlu1 %v1720_v0  ;;  %v190_v3 = vld [vmem:[%s165_s17 + $0x10] sm:$0xff]  ;;  %v1491_v4 = vpack.c.bf16 %v189_v2, %v188_v1  ;;  %v191_v5 = vld [vmem:[%s165_s17 + $0x18] sm:$0xff]  ;;  %v192_v6 = vld [vmem:[%s2166_s1] sm:$0xff]  ;;  %s187_s4 = scalar_lea.vmem [#allocation5], %s1195_s10  ;;  %s1290_s23 = sshll.u32 %s1766_s16, 7 }
  0x3b   : > { %v1495_v7 = vpack.c.bf16 %v191_v5, %v190_v3  ;;  %1373 = vmatprep.mubr.msk.f32.mxu0 %vm248_vm0, %v192_v6  ;;  %v200_v8 = vld [vmem:[%s2167_s2] sm:$0xff]  ;;  %v202_v9 = vld [vmem:[%s2167_s2 + $0x10] sm:$0xff]  ;;  %v201_v10 = vld [vmem:[%s2167_s2 + $0x8] sm:$0xff]  ;;  %s1116_s6 = sshll.u32 %s187_s4, 4  ;;  %s2121_s8 = scalar_lea.hbm %s2168_s3, %s1290_s23  ;;  %s2116_s6 = int_to_ptr.vmem [resolvable:$true] %s1116_s6 }
  0x3c   : > { %1492 = vmatprep.subr.bf16.mxu0 %v1491_v4  ;;  %210 = vperm.xlu0 %1616, %v200_v8   ;;  %v203_v11 = vld [vmem:[%s2167_s2 + $0x18] sm:$0xff]  ;;  %v193_v12 = vld [vmem:[%s2166_s1 + $0x8] sm:$0xff]  ;;  %v194_v13 = vld [vmem:[%s2166_s1 + $0x10] sm:$0xff]  ;;  %s1104_s16 = scalar_lea.sflag [#allocation4], %s1851_s9  ;;  %s1648_s19 = scalar_lea.vmem %s2116_s6, 512 }
  0x3d   : > { %1494 = vmatpush3.bf16.msra.mxu0 %v1491_v4  ;;  %220 = vperm.xlu1 %1617, %v202_v9   ;;  %v204_v14 = vld [vmem:[%s2167_s2 + $0x20] sm:$0xff]  ;;  %v205_v15 = vld [vmem:[%s2167_s2 + $0x28] sm:$0xff]  ;;  %v195_v16 = vld [vmem:[%s2166_s1 + $0x18] sm:$0xff]  ;;  %p1649_p6 = scmp.ne.s32.totalorder %s2116_s6, %s1648_s19  ;;  %p2176_p11 = scmp.ne.s32.totalorder %s2172_s24, 0 }
  0x3e   : > { %1496 = vmatprep.subr.bf16.mxu0 %v1495_v7  ;;  %v196_v17 = vld [vmem:[%s2166_s1 + $0x20] sm:$0xff]  ;;  %v206_v18 = vld [vmem:[%s2167_s2 + $0x30] sm:$0xff]  ;;  %v207_v19 = vld [vmem:[%s2167_s2 + $0x38] sm:$0xff]  ;;  %s1721_s20 = smov [#allocation5]  }
  0x3f   : > { %v197_v20 = vld [vmem:[%s2166_s1 + $0x28] sm:$0xff]  ;;  %v198_v21 = vld [vmem:[%s2166_s1 + $0x30] sm:$0xff]  ;;  %v1213_v22 = vld [vmem:[%s2167_s2 + $0x40] sm:$0xff]  ;;  %p1650_p12 = pnand %p1649_p6, %p2176_p11  ;;  %s1652_s22 = sshll.u32 %s1721_s20, 4  ;;  %s1653_s22 = int_to_ptr.vmem [resolvable:$false] %s1652_s22 }
  0x40   : > { %215 = vperm.xlu0 %1616, %v201_v10   ;;  %v1214_v23 = vld [vmem:[%s2167_s2 + $0x48] sm:$0xff]  ;;  %v199_v24 = vld [vmem:[%s2166_s1 + $0x38] sm:$0xff]  ;;  %v1215_v25 = vld [vmem:[%s2167_s2 + $0x50] sm:$0xff]  ;;  %s1654_s26 = scalar_lea.vmem %s1653_s22, 1024  ;;  %p1655_p4 = scmp.lt.s32.totalorder %s2116_s6, %s1653_s22 }
  0x41   : > { %1498 = vmatpush3.bf16.msra.mxu0 %v1495_v7  ;;  %225 = vperm.xlu1 %1617, %v203_v11   ;;  %v1216_v26 = vld [vmem:[%s2167_s2 + $0x58] sm:$0xff]  ;;  %v1217_v27 = vld [vmem:[%s2167_s2 + $0x60] sm:$0xff]  ;;  %v1218_v28 = vld [vmem:[%s2167_s2 + $0x68] sm:$0xff]  ;;  %p1651_p13 = pneg %p1650_p12  ;;  %p1656_p10 = scmp.lt.s32.totalorder %s1654_s26, %s1648_s19 }
  0x42   : > { %v1219_v29 = vld [vmem:[%s2167_s2 + $0x70] sm:$0xff]  ;;  %v1220_v30 = vld [vmem:[%s2167_s2 + $0x78] sm:$0xff]  ;;  %v1237_v31 = vld [vmem:[%s2167_s2 + $0x80] sm:$0xff] }
  0x43   : > { %v1238_v32 = vld [vmem:[%s2167_s2 + $0x88] sm:$0xff]  ;;  %v1239_v33 = vld [vmem:[%s2167_s2 + $0x90] sm:$0xff]  ;;  %v1240_v34 = vld [vmem:[%s2167_s2 + $0x98] sm:$0xff]  ;;  %p1657_p1 = por %p1656_p10, %p1655_p4 }
  0x44   : > { %1374 = vmatmul.mubr.msk.f32.vlgmr.msra.gmra.mrb[0].mxu0 %vm248_vm0, %v193_v12  ;;  %230 = vperm.xlu0 %1616, %v204_v14   ;;  %v1241_v35 = vld [vmem:[%s2167_s2 + $0xa0] sm:$0xff]  ;;  %v1242_v36 = vld [vmem:[%s2167_s2 + $0xa8] sm:$0xff]  ;;  %v1243_v37 = vld [vmem:[%s2167_s2 + $0xb0] sm:$0xff] }
  0x45   : > { %1376 = vmatprep.mubr.msk.f32.mxu0 %vm248_vm0, %v194_v13  ;;  %235 = vperm.xlu1 %1617, %v205_v15   ;;  %v1244_v38 = vld [vmem:[%s2167_s2 + $0xb8] sm:$0xff]  ;;  %v1261_v39 = vld [vmem:[%s2167_s2 + $0xc0] sm:$0xff]  ;;  %v1262_v40 = vld [vmem:[%s2167_s2 + $0xc8] sm:$0xff]  ;;  %p1658_p3 = pnand %p1657_p1, %p1651_p13 }
  0x46   : > { %v1263_v41 = vld [vmem:[%s2167_s2 + $0xd0] sm:$0xff]  ;;  %v1264_v42 = vld [vmem:[%s2167_s2 + $0xd8] sm:$0xff]  ;;  %v1265_v43 = vld [vmem:[%s2167_s2 + $0xe0] sm:$0xff] }
  0x47   : > { %v1266_v44 = vld [vmem:[%s2167_s2 + $0xe8] sm:$0xff]  ;;  %v1267_v45 = vld [vmem:[%s2167_s2 + $0xf0] sm:$0xff]  ;;  %v1268_v46 = vld [vmem:[%s2167_s2 + $0xf8] sm:$0xff] }
  0x48   : > { %1377 = vmatmul.mubr.msk.f32.gmra.mrb[2].mxu0 %vm248_vm0, %v195_v16  ;;  %240 = vperm.xlu0 %1616, %v206_v18   ;;  %v1281_v47 = vld [vmem:[%s2167_s2 + $0x100] sm:$0xff]  ;;  %v1282_v48 = vld [vmem:[%s2167_s2 + $0x108] sm:$0xff]  ;;  %v1283_v49 = vld [vmem:[%s2167_s2 + $0x110] sm:$0xff] }
  0x49   : > { %1379 = vmatprep.mubr.msk.f32.mxu0 %vm248_vm0, %v196_v17  ;;  %245 = vperm.xlu1 %1617, %v207_v19   ;;  %v1284_v50 = vld [vmem:[%s2167_s2 + $0x118] sm:$0xff]  ;;  %v1205_v51 = vld [vmem:[%s2166_s1 + $0x40] sm:$0xff] }
  0x4a   : > { %1401 = vmatprep.mubr.msk.f32.mxu1 %vm444_vm1, %v1205_v51 }
  0x4c   : > { %1380 = vmatmul.mubr.msk.f32.gmra.mrb[4].mxu0 %vm248_vm0, %v197_v20  ;;  %406 = vperm.xlu0 %1616, %v1213_v22  }
  0x4d   : > { %1382 = vmatprep.mubr.msk.f32.mxu0 %vm248_vm0, %v198_v21  ;;  %411 = vperm.xlu1 %1617, %v1214_v23  }
  0x50   : > { %1383 = vmatmul.mubr.msk.f32.gmra.mrb[6].mxu0 %vm248_vm0, %v199_v24  ;;  %416 = vperm.xlu0 %1616, %v1215_v25   ;;  %v1206_v24 = vld [vmem:[%s2166_s1 + $0x48] sm:$0xff]  ;;  %v1207_v25 = vld [vmem:[%s2166_s1 + $0x50] sm:$0xff] }
  0x51   : > { %421 = vperm.xlu1 %1617, %v1216_v26   ;;  %v1208_v26 = vld [vmem:[%s2166_s1 + $0x58] sm:$0xff] }
  0x54   : > { %426 = vperm.xlu0 %1616, %v1217_v27   ;;  %v1209_v27 = vld [vmem:[%s2166_s1 + $0x60] sm:$0xff] }
  0x55   : > { %431 = vperm.xlu1 %1617, %v1218_v28   ;;  %v1210_v28 = vld [vmem:[%s2166_s1 + $0x68] sm:$0xff] }
  0x58   : > { %436 = vperm.xlu0 %1616, %v1219_v29   ;;  %v1211_v29 = vld [vmem:[%s2166_s1 + $0x70] sm:$0xff] }
  0x59   : > { %441 = vperm.xlu1 %1617, %v1220_v30   ;;  %v1212_v30 = vld [vmem:[%s2166_s1 + $0x78] sm:$0xff] }
  0x5c   : > { %602 = vperm.xlu0 %1616, %v1237_v31   ;;  %v1229_v31 = vld [vmem:[%s2166_s1 + $0x80] sm:$0xff] }
  0x5d   : > { %607 = vperm.xlu1 %1617, %v1238_v32   ;;  %1429 = vmatprep.mubr.msk.f32.mxu0 %vm444_vm1, %v1229_v31 }
  0x60   : > { %612 = vperm.xlu0 %1616, %v1239_v33  }
  0x61   : > { %617 = vperm.xlu1 %1617, %v1240_v34  }
  0x64   : > { %622 = vperm.xlu0 %1616, %v1241_v35  }
  0x65   : > { %627 = vperm.xlu1 %1617, %v1242_v36  }
  0x68   : > { %632 = vperm.xlu0 %1616, %v1243_v37  }
  0x69   : > { %637 = vperm.xlu1 %1617, %v1244_v38  }
  0x6c   : > { %797 = vperm.xlu0 %1616, %v1261_v39  }
  0x6d   : > { %802 = vperm.xlu1 %1617, %v1262_v40  }
  0x70   : > { %807 = vperm.xlu0 %1616, %v1263_v41  }
  0x71   : > { %812 = vperm.xlu1 %1617, %v1264_v42  }
  0x74   : > { %817 = vperm.xlu0 %1616, %v1265_v43  }
  0x75   : > { %822 = vperm.xlu1 %1617, %v1266_v44  }
  0x78   : > { %827 = vperm.xlu0 %1616, %v1267_v45  }
  0x79   : > { %832 = vperm.xlu1 %1617, %v1268_v46  }
  0x7c   : > { %984 = vperm.xlu0 %1616, %v1281_v47  }
  0x7d   : > { %989 = vperm.xlu1 %1617, %v1282_v48  }
  0x80   : > { %994 = vperm.xlu0 %1616, %v1283_v49  }
  0x81   : > { %999 = vperm.xlu1 %1617, %v1284_v50  }
  0xbb   : > { %v211_v52 = vpop.permute.xlu0 %210 }
  0xbc   : > { %v221_v53 = vpop.permute.xlu1 %220 }
  0xbf   : > { %v216_v54 = vpop.permute.xlu0 %215 }
  0xc0   : > { %v226_v55 = vpop.permute.xlu1 %225 }
  0xc3   : > { %v231_v4 = vpop.permute.xlu0 %230 }
  0xc4   : > { %v236_v1 = vpop.permute.xlu1 %235 }
  0xc7   : > { %v241_v16 = vpop.permute.xlu0 %240 }
  0xc8   : > { %v246_v13 = vpop.permute.xlu1 %245 }
  0xcb   : > { %v407_v33 = vpop.permute.xlu0 %406 }
  0xcc   : > { %v412_v32 = vpop.permute.xlu1 %411 }
  0xcf   : > { %v417_v36 = vpop.permute.xlu0 %416 }
  0xd0   : > { %v422_v34 = vpop.permute.xlu1 %421 }
  0xd3   : > { %v427_v48 = vpop.permute.xlu0 %426 }
  0xd4   : > { %v432_v45 = vpop.permute.xlu1 %431 }
 0x117   : > { %v1375_v56 = vpop.f32.mrb[0].mxu0 }
 0x118   : > { %v345_v57 = vadd.f32 %v1375_v56, %v216_v54  ;;  %v339_v58 = vpop.f32.mrb[1].mxu0 }
 0x119   : > { %v340_v59 = vadd.f32 %v339_v58, %v211_v52 }
 0x11a   : > { %v379_v60 = vmax.f32 %v345_v57, 0.0  ;;  %v442_v57 = vpop.permute.xlu1 %441 }
 0x11b   : > { %v378_v61 = vmax.f32 %v340_v59, 0.0  ;;  %v1378_v62 = vpop.f32.mrb[2].mxu0 }
 0x11c   : > { %v355_v63 = vadd.f32 %v1378_v62, %v226_v55  ;;  %v349_v0 = vpop.f32.mrb[3].mxu0 }
 0x11d   : > { %v350_v2 = vadd.f32 %v349_v0, %v221_v53  ;;  %v1499_v3 = vpack.c.bf16 %v379_v60, %v378_v61  ;;  %v437_v60 = vpop.permute.xlu0 %436 }
 0x11e   : > { %v381_v5 = vmax.f32 %v355_v63, 0.0 }
 0x11f   : > { %v380_v6 = vmax.f32 %v350_v2, 0.0  ;;  %v1381_v7 = vpop.f32.mrb[4].mxu0  ;;  %1500 = vmatprep.subr.bf16.mxu1 %v1499_v3 }
 0x120   : > { %v365_v8 = vadd.f32 %v1381_v7, %v236_v1  ;;  %v359_v9 = vpop.f32.mrb[5].mxu0  ;;  %1502 = vmatpush3.bf16.msra.mxu1 %v1499_v3  ;;  %v1233_v7 = vld [vmem:[%s2166_s1 + $0xa0] sm:$0xff] }
 0x121   : > { %v1503_v10 = vpack.c.bf16 %v381_v5, %v380_v6  ;;  %v360_v11 = vadd.f32 %v359_v9, %v231_v4  ;;  %v1230_v4 = vld [vmem:[%s2166_s1 + $0x88] sm:$0xff]  ;;  %v1231_v5 = vld [vmem:[%s2166_s1 + $0x90] sm:$0xff]  ;;  %v1232_v6 = vld [vmem:[%s2166_s1 + $0x98] sm:$0xff] }
 0x122   : > { %v383_v12 = vmax.f32 %v365_v8, 0.0  ;;  %v1234_v8 = vld [vmem:[%s2166_s1 + $0xa8] sm:$0xff]  ;;  %v1235_v9 = vld [vmem:[%s2166_s1 + $0xb0] sm:$0xff] }
 0x123   : > { %v382_v14 = vmax.f32 %v360_v11, 0.0  ;;  %v1384_v15 = vpop.f32.mrb[6].mxu0  ;;  %1504 = vmatprep.subr.bf16.mxu1 %v1503_v10  ;;  %v1253_v11 = vld [vmem:[%s2166_s1 + $0xc0] sm:$0xff] }
 0x124   : > { %v375_v17 = vadd.f32 %v1384_v15, %v246_v13  ;;  %v369_v18 = vpop.f32.mrb[7].mxu0  ;;  %1506 = vmatpush3.bf16.msra.mxu1 %v1503_v10  ;;  %v1236_v10 = vld [vmem:[%s2166_s1 + $0xb8] sm:$0xff]  ;;  %v603_v13 = vpop.permute.xlu0 %602 }
 0x125   : > { %v1507_v19 = vpack.c.bf16 %v383_v12, %v382_v14  ;;  %v370_v20 = vadd.f32 %v369_v18, %v241_v16  ;;  %v608_v12 = vpop.permute.xlu1 %607 }
 0x126   : > { %v385_v21 = vmax.f32 %v375_v17, 0.0 }
 0x127   : > { %v384_v22 = vmax.f32 %v370_v20, 0.0  ;;  %1508 = vmatprep.subr.bf16.mxu1 %v1507_v19 }
 0x128   : > { %1510 = vmatpush3.bf16.msra.mxu1 %v1507_v19  ;;  %v613_v16 = vpop.permute.xlu0 %612 }
 0x129   : > { %v1511_v23 = vpack.c.bf16 %v385_v21, %v384_v22  ;;  %v618_v14 = vpop.permute.xlu1 %617 }
 0x12b   : > { %1512 = vmatprep.subr.bf16.mxu1 %v1511_v23 }
 0x12c   : > { %1514 = vmatpush3.bf16.msra.mxu1 %v1511_v23 }
 0x12f   : > { %1402 = vmatmul.mubr.msk.f32.vlgmr.msra.gmra.mrb[0].mxu1 %vm444_vm1, %v1206_v24 }
 0x130   : > { %1404 = vmatprep.mubr.msk.f32.mxu1 %vm444_vm1, %v1207_v25  ;;  %v628_v25 = vpop.permute.xlu1 %627 }
 0x133   : > { %1405 = vmatmul.mubr.msk.f32.gmra.mrb[2].mxu1 %vm444_vm1, %v1208_v26 }
 0x134   : > { %1407 = vmatprep.mubr.msk.f32.mxu1 %vm444_vm1, %v1209_v27 }
 0x137   : > { %1408 = vmatmul.mubr.msk.f32.gmra.mrb[4].mxu1 %vm444_vm1, %v1210_v28  ;;  %v623_v28 = vpop.permute.xlu0 %622 }
 0x138   : > { %1410 = vmatprep.mubr.msk.f32.mxu1 %vm444_vm1, %v1211_v29 }
 0x13b   : > { %1411 = vmatmul.mubr.msk.f32.gmra.mrb[6].mxu1 %vm444_vm1, %v1212_v30 }
 0x13c   : > { %1457 = vmatprep.mubr.msk.f32.mxu1 %vm444_vm1, %v1253_v11 }
 0x202   : > { %v1403_v35 = vpop.f32.mrb[0].mxu1 }
 0x203   : > { %v541_v37 = vadd.f32 %v1403_v35, %v412_v32  ;;  %v535_v38 = vpop.f32.mrb[1].mxu1 }
 0x204   : > { %v536_v39 = vadd.f32 %v535_v38, %v407_v33 }
 0x205   : > { %v575_v40 = vmax.f32 %v541_v37, 0.0  ;;  %v638_v37 = vpop.permute.xlu1 %637 }
 0x206   : > { %v574_v41 = vmax.f32 %v536_v39, 0.0  ;;  %v1406_v42 = vpop.f32.mrb[2].mxu1 }
 0x207   : > { %v551_v43 = vadd.f32 %v1406_v42, %v422_v34  ;;  %v545_v44 = vpop.f32.mrb[3].mxu1 }
 0x208   : > { %v1515_v46 = vpack.c.bf16 %v575_v40, %v574_v41  ;;  %v546_v47 = vadd.f32 %v545_v44, %v417_v36  ;;  %v633_v40 = vpop.permute.xlu0 %632 }
 0x209   : > { %v577_v49 = vmax.f32 %v551_v43, 0.0 }
 0x20a   : > { %v576_v50 = vmax.f32 %v546_v47, 0.0  ;;  %v1409_v51 = vpop.f32.mrb[4].mxu1  ;;  %1516 = vmatprep.subr.bf16.mxu0 %v1515_v46 }
 0x20b   : > { %v561_v52 = vadd.f32 %v1409_v51, %v432_v45  ;;  %v555_v53 = vpop.f32.mrb[5].mxu1  ;;  %1518 = vmatpush3.bf16.msra.mxu0 %v1515_v46  ;;  %v1257_v51 = vld [vmem:[%s2166_s1 + $0xe0] sm:$0xff] }
 0x20c   : > { %v1519_v54 = vpack.c.bf16 %v577_v49, %v576_v50  ;;  %v556_v55 = vadd.f32 %v555_v53, %v427_v48  ;;  %v1254_v48 = vld [vmem:[%s2166_s1 + $0xc8] sm:$0xff]  ;;  %v1255_v49 = vld [vmem:[%s2166_s1 + $0xd0] sm:$0xff]  ;;  %v1256_v50 = vld [vmem:[%s2166_s1 + $0xd8] sm:$0xff] }
 0x20d   : > { %v579_v56 = vmax.f32 %v561_v52, 0.0  ;;  %v1258_v52 = vld [vmem:[%s2166_s1 + $0xe8] sm:$0xff]  ;;  %v1259_v53 = vld [vmem:[%s2166_s1 + $0xf0] sm:$0xff] }
 0x20e   : > { %v578_v58 = vmax.f32 %v556_v55, 0.0  ;;  %v1412_v59 = vpop.f32.mrb[6].mxu1  ;;  %1520 = vmatprep.subr.bf16.mxu0 %v1519_v54  ;;  %v1277_v55 = vld [vmem:[%s2166_s1 + $0x100] sm:$0xff] }
 0x20f   : > { %v571_v61 = vadd.f32 %v1412_v59, %v442_v57  ;;  %v565_v62 = vpop.f32.mrb[7].mxu1  ;;  %1522 = vmatpush3.bf16.msra.mxu0 %v1519_v54  ;;  %v1260_v54 = vld [vmem:[%s2166_s1 + $0xf8] sm:$0xff]  ;;  %v798_v57 = vpop.permute.xlu0 %797 }
 0x210   : > { %v1523_v63 = vpack.c.bf16 %v579_v56, %v578_v58  ;;  %v566_v0 = vadd.f32 %v565_v62, %v437_v60  ;;  %v803_v56 = vpop.permute.xlu1 %802 }
 0x211   : > { %v581_v1 = vmax.f32 %v571_v61, 0.0 }
 0x212   : > { %v580_v2 = vmax.f32 %v566_v0, 0.0  ;;  %1524 = vmatprep.subr.bf16.mxu0 %v1523_v63 }
 0x213   : > { %1526 = vmatpush3.bf16.msra.mxu0 %v1523_v63  ;;  %v808_v60 = vpop.permute.xlu0 %807 }
 0x214   : > { %v1527_v3 = vpack.c.bf16 %v581_v1, %v580_v2  ;;  %v813_v58 = vpop.permute.xlu1 %812 }
 0x216   : > { %1528 = vmatprep.subr.bf16.mxu0 %v1527_v3 }
 0x217   : > { %1530 = vmatpush3.bf16.msra.mxu0 %v1527_v3 }
 0x21a   : > { %1430 = vmatmul.mubr.msk.f32.vlgmr.msra.gmra.mrb[8].mxu0 %vm444_vm1, %v1230_v4 }
 0x21b   : > { %1432 = vmatprep.mubr.msk.f32.mxu0 %vm444_vm1, %v1231_v5  ;;  %v823_v5 = vpop.permute.xlu1 %822 }
 0x21e   : > { %1433 = vmatmul.mubr.msk.f32.gmra.mrb[10].mxu0 %vm444_vm1, %v1232_v6 }
 0x21f   : > { %1435 = vmatprep.mubr.msk.f32.mxu0 %vm444_vm1, %v1233_v7 }
 0x222   : > { %1436 = vmatmul.mubr.msk.f32.gmra.mrb[12].mxu0 %vm444_vm1, %v1234_v8  ;;  %v818_v8 = vpop.permute.xlu0 %817 }
 0x223   : > { %1438 = vmatprep.mubr.msk.f32.mxu0 %vm444_vm1, %v1235_v9 }
 0x226   : > { %1439 = vmatmul.mubr.msk.f32.gmra.mrb[14].mxu0 %vm444_vm1, %v1236_v10 }
 0x227   : > { %1485 = vmatprep.mubr.msk.f32.mxu0 %vm444_vm1, %v1277_v55 }
 0x2ed   : > { %v1431_v15 = vpop.f32.mrb[8].mxu0 }
 0x2ee   : > { %v736_v17 = vadd.f32 %v1431_v15, %v608_v12  ;;  %v730_v18 = vpop.f32.mrb[9].mxu0 }
 0x2ef   : > { %v731_v19 = vadd.f32 %v730_v18, %v603_v13 }
 0x2f0   : > { %v770_v20 = vmax.f32 %v736_v17, 0.0  ;;  %v833_v17 = vpop.permute.xlu1 %832 }
 0x2f1   : > { %v769_v21 = vmax.f32 %v731_v19, 0.0  ;;  %v1434_v22 = vpop.f32.mrb[10].mxu0 }
 0x2f2   : > { %v746_v23 = vadd.f32 %v1434_v22, %v618_v14  ;;  %v740_v24 = vpop.f32.mrb[11].mxu0 }
 0x2f3   : > { %v1531_v26 = vpack.c.bf16 %v770_v20, %v769_v21  ;;  %v741_v27 = vadd.f32 %v740_v24, %v613_v16  ;;  %v828_v20 = vpop.permute.xlu0 %827 }
 0x2f4   : > { %v772_v29 = vmax.f32 %v746_v23, 0.0 }
 0x2f5   : > { %v771_v30 = vmax.f32 %v741_v27, 0.0  ;;  %v1437_v31 = vpop.f32.mrb[12].mxu0  ;;  %1532 = vmatprep.subr.bf16.mxu1 %v1531_v26 }
 0x2f6   : > { %v756_v32 = vadd.f32 %v1437_v31, %v628_v25  ;;  %v750_v33 = vpop.f32.mrb[13].mxu0  ;;  %1534 = vmatpush3.bf16.msra.mxu1 %v1531_v26  ;;  %v990_v31 = vpop.permute.xlu1 %989 }
 0x2f7   : > { %v1535_v34 = vpack.c.bf16 %v772_v29, %v771_v30  ;;  %v751_v35 = vadd.f32 %v750_v33, %v623_v28  ;;  %v1278_v28 = vld [vmem:[%s2166_s1 + $0x108] sm:$0xff]  ;;  %v1279_v29 = vld [vmem:[%s2166_s1 + $0x110] sm:$0xff]  ;;  %v1280_v30 = vld [vmem:[%s2166_s1 + $0x118] sm:$0xff] }
 0x2f8   : > { %v774_v36 = vmax.f32 %v756_v32, 0.0  ;;  %v985_v32 = vpop.permute.xlu0 %984 }
 0x2f9   : > { %v773_v38 = vmax.f32 %v751_v35, 0.0  ;;  %v1440_v39 = vpop.f32.mrb[14].mxu0  ;;  %1536 = vmatprep.subr.bf16.mxu1 %v1535_v34 }
 0x2fa   : > { %v766_v41 = vadd.f32 %v1440_v39, %v638_v37  ;;  %v760_v42 = vpop.f32.mrb[15].mxu0  ;;  %1538 = vmatpush3.bf16.msra.mxu1 %v1535_v34  ;;  %v1000_v37 = vpop.permute.xlu1 %999 }
 0x2fb   : > { %v1539_v43 = vpack.c.bf16 %v774_v36, %v773_v38  ;;  %v761_v44 = vadd.f32 %v760_v42, %v633_v40 }
 0x2fc   : > { %v776_v45 = vmax.f32 %v766_v41, 0.0  ;;  %v995_v39 = vpop.permute.xlu0 %994 }
 0x2fd   : > { %v775_v46 = vmax.f32 %v761_v44, 0.0  ;;  %1540 = vmatprep.subr.bf16.mxu1 %v1539_v43 }
 0x2fe   : > { %1542 = vmatpush3.bf16.msra.mxu1 %v1539_v43 }
 0x2ff   : > { %v1543_v47 = vpack.c.bf16 %v776_v45, %v775_v46 }
 0x301   : > { %1544 = vmatprep.subr.bf16.mxu1 %v1543_v47 }
 0x302   : > { %1546 = vmatpush3.bf16.msra.mxu1 %v1543_v47 }
 0x305   : > { %1458 = vmatmul.mubr.msk.f32.vlgmr.msra.gmra.mrb[8].mxu1 %vm444_vm1, %v1254_v48 }
 0x306   : > { %1460 = vmatprep.mubr.msk.f32.mxu1 %vm444_vm1, %v1255_v49 }
 0x309   : > { %1461 = vmatmul.mubr.msk.f32.gmra.mrb[10].mxu1 %vm444_vm1, %v1256_v50 }
 0x30a   : > { %1463 = vmatprep.mubr.msk.f32.mxu1 %vm444_vm1, %v1257_v51 }
 0x30d   : > { %1464 = vmatmul.mubr.msk.f32.gmra.mrb[12].mxu1 %vm444_vm1, %v1258_v52 }
 0x30e   : > { %1466 = vmatprep.mubr.msk.f32.mxu1 %vm444_vm1, %v1259_v53 }
 0x311   : > { %1467 = vmatmul.mubr.msk.f32.gmra.mrb[14].mxu1 %vm444_vm1, %v1260_v54 }
 0x3d8   : > { %v1459_v59 = vpop.f32.mrb[8].mxu1 }
 0x3d9   : > { %v931_v61 = vadd.f32 %v1459_v59, %v803_v56  ;;  %v925_v62 = vpop.f32.mrb[9].mxu1 }
 0x3da   : > { %v926_v63 = vadd.f32 %v925_v62, %v798_v57 }
 0x3db   : > { %v965_v0 = vmax.f32 %v931_v61, 0.0 }
 0x3dc   : > { %v964_v1 = vmax.f32 %v926_v63, 0.0  ;;  %v1462_v2 = vpop.f32.mrb[10].mxu1 }
 0x3dd   : > { %v941_v3 = vadd.f32 %v1462_v2, %v813_v58  ;;  %v935_v4 = vpop.f32.mrb[11].mxu1 }
 0x3de   : > { %v1547_v6 = vpack.c.bf16 %v965_v0, %v964_v1  ;;  %v936_v7 = vadd.f32 %v935_v4, %v808_v60 }
 0x3df   : > { %v967_v9 = vmax.f32 %v941_v3, 0.0 }
 0x3e0   : > { %v966_v10 = vmax.f32 %v936_v7, 0.0  ;;  %v1465_v11 = vpop.f32.mrb[12].mxu1  ;;  %1548 = vmatprep.subr.bf16.mxu0 %v1547_v6 }
 0x3e1   : > { %v951_v12 = vadd.f32 %v1465_v11, %v823_v5  ;;  %v945_v13 = vpop.f32.mrb[13].mxu1  ;;  %1550 = vmatpush3.bf16.msra.mxu0 %v1547_v6 }
 0x3e2   : > { %v1551_v14 = vpack.c.bf16 %v967_v9, %v966_v10  ;;  %v946_v15 = vadd.f32 %v945_v13, %v818_v8 }
 0x3e3   : > { %v969_v16 = vmax.f32 %v951_v12, 0.0 }
 0x3e4   : > { %v968_v18 = vmax.f32 %v946_v15, 0.0  ;;  %v1468_v19 = vpop.f32.mrb[14].mxu1  ;;  %1552 = vmatprep.subr.bf16.mxu0 %v1551_v14 }
 0x3e5   : > { %v961_v21 = vadd.f32 %v1468_v19, %v833_v17  ;;  %v955_v22 = vpop.f32.mrb[15].mxu1  ;;  %1554 = vmatpush3.bf16.msra.mxu0 %v1551_v14 }
 0x3e6   : > { %v1555_v23 = vpack.c.bf16 %v969_v16, %v968_v18  ;;  %v956_v24 = vadd.f32 %v955_v22, %v828_v20 }
 0x3e7   : > { %v971_v25 = vmax.f32 %v961_v21, 0.0 }
 0x3e8   : > { %v970_v26 = vmax.f32 %v956_v24, 0.0  ;;  %1556 = vmatprep.subr.bf16.mxu0 %v1555_v23 }
 0x3e9   : > { %1558 = vmatpush3.bf16.msra.mxu0 %v1555_v23 }
 0x3ea   : > { %v1559_v27 = vpack.c.bf16 %v971_v25, %v970_v26 }
 0x3ec   : > { %1560 = vmatprep.subr.bf16.mxu0 %v1559_v27 }
 0x3ed   : > { %1562 = vmatpush3.bf16.msra.mxu0 %v1559_v27 }
 0x3f0   : > { %1486 = vmatmul.mubr.msk.f32.vlgmr.msra.gmra.mrb[16].mxu0 %vm444_vm1, %v1278_v28 }
 0x3f1   : > { %1488 = vmatprep.mubr.msk.f32.mxu0 %vm444_vm1, %v1279_v29 }
 0x3f4   : > { %1489 = vmatmul.mubr.msk.f32.gmra.mrb[18].mxu0 %vm444_vm1, %v1280_v30 }
 0x4c3   : > { %v1487_v33 = vpop.f32.mrb[16].mxu0 }
 0x4c4   : > { %v1086_v34 = vadd.f32 %v1487_v33, %v990_v31  ;;  %v1080_v35 = vpop.f32.mrb[17].mxu0 }
 0x4c5   : > { %v1081_v36 = vadd.f32 %v1080_v35, %v985_v32 }
 0x4c6   : > { %1100 = vst [vmem:[%s187_s4 + $0x8] sm:$0xff] %v1086_v34 }
 0x4c7   : > { %1099 = vst [vmem:[%s187_s4] sm:$0xff] %v1081_v36  ;;  %v1490_v38 = vpop.f32.mrb[18].mxu0 }
 0x4c8   : > { %v1096_v40 = vadd.f32 %v1490_v38, %v1000_v37  ;;  %v1090_v41 = vpop.f32.mrb[19].mxu0 }
 0x4c9   : > { %v1091_v42 = vadd.f32 %v1090_v41, %v995_v39 }
 0x4ca   : > { %1102 = vst [vmem:[%s187_s4 + $0x18] sm:$0xff] %v1096_v40 }
 0x4cb   : > { %1101 = vst [vmem:[%s187_s4 + $0x10] sm:$0xff] %v1091_v42 }
 0x4cc   : > { %1661 = shalt.err (!%p1658_p3)
}
 0x4cd   : > { %s1662_s27 = scalar_lea.hbm %s2121_s8, 512  ;;  %s1666_s30 = scalar_lea.hbm %s2168_s3, 1024 }
 0x4ce   : > { %p1663_p5 = scmp.ne.s32.totalorder %s2121_s8, %s1662_s27  ;;  %p1667_p9 = scmp.lt.u32.totalorder %s2121_s8, %s2168_s3 }
 0x4cf   : > { %p1668_p0 = scmp.lt.u32.totalorder %s1666_s30, %s1662_s27  ;;  %p1670_p6 = scmp.lt.u32.totalorder %s1662_s27, %s2121_s8 }
 0x4d0   : > { %p1664_p7 = pnand %p1663_p5, %p2176_p11 }
 0x4d1   : > { %p1669_p2 = por %p1668_p0, %p1667_p9 }
 0x4d2   : > { %p1665_p8 = pneg %p1664_p7 }
 0x4d3   : > { %p1671_p12 = por %p1670_p6, %p1669_p2 }
 0x4d5   : > { %p1672_p13 = pnand %p1671_p12, %p1665_p8 }
 0x4d7   : > { %1675 = shalt.err (!%p1672_p13)
}
 0x4d8   : > { %s1722_s17 = smov 128   ;;  %s1723_s4 = smov 256  }
 0x4d9   : > { %s1724_s23 = smov 8  }
 0x4da   : > { %1565 = dma.vmem_to_hbm [thread:$0]  (%p2176_p11), %s2116_s6, 512, %s2121_s8, %s1104_s16, %s1722_s17, %s1723_s4, %s1724_s23  }
 0x4db PF: > { %s1131_s7 = sand.u32 1, %s1702_s12   ;;  %p2177_p4 = scmp.ne.s32.totalorder %s2173_s25, 0 }
 0x4dc   : > { %p2178_p10 = scmp.ge.s32.totalorder %s1714_s15, 2  ;;  %s1132_s10 = scalar_lea.sflag [#allocation4], %s1131_s7 }
 0x4de   : > { %p1572_p1 = pnand %p2178_p10, %p2177_p4 }
 0x4e0   : > { %1697 = dma.done.wait (!%p1572_p1), %s1132_s10, 512  }
 0x4e1   : > { %1699 = vsyncadd (!%p1572_p1), %s1132_s10, 4294966784  ;;  %p16_p3 = scmp.ge.s32.totalorder %s1770_s18, 4   ;;  %s2179_s12 = smov %s1706_s13 }
 0x4e2   : > { %s2180_s13 = smov %s1710_s14  ;;  %s2181_s14 = smov %s1782_s21 }
 0x4e3   : > { %s2182_s15 = smov %s1770_s18  ;;  %18 = sbr.rel (!%p16_p3) target bundleno = 5 (0x5), region = 85 }
 0x4ea   :  { %1137 = vsyncpa [#allocation3], 1 }
 0x4eb   :  { %1139 = vsyncpa [#allocation3 + $0x1], 1 }
 0x4ec   :  { %1140 = vsyncpa [#allocation4], 1 }
 0x4ed   :  { %1142 = vsyncpa [#allocation4 + $0x1], 1 }

</bundles_post_ra>
